<compile_context>
chip_gen: v7x
topology: tpu7x:2x2x1
jax: 0.10.0
libtpu: 0.0.40
codegen_flags: <defaults>
</compile_context>

<pallas_src>
import math

import jax
import jax.numpy as jnp
from jax.experimental import pallas as pl
from jax.experimental.pallas import tpu as pltpu

# ----- small model dims, structurally consistent with TransformerModel ------
B = 2              # batch size
S = 8              # input sequence length (before the prepended zero token)
IN_TOKENS = 24     # PyTorch: 534
D_EMBED_FF = 48    # PyTorch: 1200
D_MODEL = 32       # PyTorch: 800
NHEAD = 4          # PyTorch: 8
HEAD_DIM = D_MODEL // NHEAD
D_FF = 32          # PyTorch: 800 (dim_feedforward)
OUT_TOKENS = 16    # PyTorch: 250
EPS = 1e-5         # nn.LayerNorm default eps
NEG_INF = -1e30    # additive key-padding-mask bias

BP = 8             # batch rows padded to a full sublane group (single dense store)
OUT_PAD = 128      # decoder output lanes padded to one full lane group


def _layer_norm(x, g, b):
    mu = jnp.mean(x, axis=-1, keepdims=True)
    var = jnp.mean(jnp.square(x - mu), axis=-1, keepdims=True)
    return (x - mu) * jax.lax.rsqrt(var + EPS) * g + b


# ---------------------------------------------------------------------------
# Fused kernel: embed MLP + pos-encoding + encoder layer (row-0 path) + decoder
# ---------------------------------------------------------------------------
def fused_transformer_kernel(
        src_ref, maskb_ref, pe_ref,
        ew1_ref, eb1_ref, eg_ref, ebt_ref, ew2_ref, eb2_ref,
        bq_ref, wk_ref, bk_ref, wv_ref, bv_ref, wo_ref, bo_ref,
        g1_ref, be1_ref, wf1_ref, bf1_ref, wf2_ref, bf2_ref,
        g2_ref, be2_ref, wd_ref, bd_ref,
        hsel_ref, hselt_ref, bsel_ref,
        out_ref):
    # ---- embed MLP (Linear -> LayerNorm -> ReLU -> Linear) on all B*S tokens ----
    x = src_ref[...]                                                   # (B*S, IN_TOKENS)
    h = jnp.dot(x, ew1_ref[...], preferred_element_type=jnp.float32) + eb1_ref[...]
    h = _layer_norm(h, eg_ref[...], ebt_ref[...])
    h = jnp.maximum(h, 0.0)                                            # ReLU
    e = jnp.dot(h, ew2_ref[...], preferred_element_type=jnp.float32) + eb2_ref[...]
    e = e + pe_ref[...]                          # PositionalEncoding (dropout = identity)

    # ---- K / V projections for all tokens of both batches in one matmul each ----
    k_all = jnp.dot(e, wk_ref[...], preferred_element_type=jnp.float32) + bk_ref[...]
    v_all = jnp.dot(e, wv_ref[...], preferred_element_type=jnp.float32) + bv_ref[...]

    # Only output[0] is decoded; the zero token is prepended AFTER embed + PE, so the
    # only query needed is q0 = 0 @ Wq + bq = bq (identical for every batch element),
    # and the extra never-masked key/value are k0 = bk, v0 = bv.
    q0 = bq_ref[...]                                                   # (1, D_MODEL)
    hsel = hsel_ref[...]                                               # (D_MODEL, NHEAD)
    hselt = hselt_ref[...]                                             # (NHEAD, D_MODEL)
    bsel = bsel_ref[...]                                               # (BP, B*S) batch selector
    scale = 1.0 / math.sqrt(HEAD_DIM)

    # Per-head logits for every real key of both batches (no lane slicing per head):
    # scores[row, h] = <q0, k_row> restricted to head h, plus additive padding bias.
    scores = jnp.dot(q0 * k_all, hsel,
                     preferred_element_type=jnp.float32) * scale       # (B*S, NHEAD)
    scores = scores + maskb_ref[...]                                   # hoisted mask add
    score0 = jnp.dot(q0 * bk_ref[...], hsel,
                     preferred_element_type=jnp.float32) * scale       # (1, NHEAD)

    # One shared per-head max across all batches (a per-head constant cancels in
    # softmax, so this is exact) keeps all exps <= 1 -- no per-batch slicing needed.
    m = jnp.maximum(jnp.max(scores, axis=0, keepdims=True), score0)    # (1, NHEAD)
    p = jnp.exp(scores - m)                                            # (B*S, NHEAD)
    p0 = jnp.exp(score0 - m)                                           # (1, NHEAD)

    # Per-batch softmax denominators via the batch-selector matmul (rows >= B are pad).
    l = jnp.dot(bsel, p, preferred_element_type=jnp.float32) + p0      # (BP, NHEAD)

    # Expand per-head weights onto D_MODEL lanes, reduce over keys per batch on the MXU.
    p_lanes = jnp.dot(p, hselt, preferred_element_type=jnp.float32)    # (B*S, D_MODEL)
    ctx = jnp.dot(bsel, p_lanes * v_all,
                  preferred_element_type=jnp.float32)                  # (BP, D_MODEL)
    ctx = ctx + jnp.dot(p0, hselt, preferred_element_type=jnp.float32) * bv_ref[...]
    l_lanes = jnp.dot(l, hselt, preferred_element_type=jnp.float32)    # (BP, D_MODEL)
    ctx = ctx * pl.reciprocal(l_lanes, approx=True)                    # normalize per head

    # ---- batched encoder-layer tail for all BP rows at once ----
    attn = jnp.dot(ctx, wo_ref[...],
                   preferred_element_type=jnp.float32) + bo_ref[...]   # (BP, D_MODEL)

    # post-LN residual blocks; the residual input at row 0 is the zero token.
    y = _layer_norm(attn, g1_ref[...], be1_ref[...])
    f = jnp.maximum(
        jnp.dot(y, wf1_ref[...], preferred_element_type=jnp.float32) + bf1_ref[...], 0.0)
    f = jnp.dot(f, wf2_ref[...], preferred_element_type=jnp.float32) + bf2_ref[...]
    z = _layer_norm(y + f, g2_ref[...], be2_ref[...])

    # decoder Linear(d_model, out_tokens), zero-padded to 128 lanes:
    # single unmasked, lane- and sublane-dense (8,128) store.
    out_ref[...] = (
        jnp.dot(z, wd_ref[...], preferred_element_type=jnp.float32) + bd_ref[...])


# ---------------------------------------------------------------------------
# Wrapper / parameter preparation
# ---------------------------------------------------------------------------
def make_positional_encoding(seq_len, d_model):
    position = jnp.arange(seq_len, dtype=jnp.float32)[:, None]
    div_term = jnp.exp(jnp.arange(0, d_model, 2, dtype=jnp.float32)
                       * (-math.log(10000.0) / d_model))
    ang = position * div_term
    pe = jnp.zeros((seq_len, d_model), jnp.float32)
    pe = pe.at[:, 0::2].set(jnp.sin(ang))
    pe = pe.at[:, 1::2].set(jnp.cos(ang))
    return pe


def make_head_selector():
    # Hsel[d, h] = 1 if channel d belongs to head h else 0.
    d = jnp.arange(D_MODEL) // HEAD_DIM
    h = jnp.arange(NHEAD)
    return (d[:, None] == h[None, :]).astype(jnp.float32)              # (D_MODEL, NHEAD)


def make_batch_selector():
    # Bsel[b, b*S + s] = 1 for b < B; rows B..BP-1 are zero pad rows.
    rows = jnp.arange(BP)[:, None]
    cols = jnp.arange(B * S)[None, :]
    return ((cols // S) == rows).astype(jnp.float32)                   # (BP, B*S)


def prepare_params(params):
    """One-time, outside-jit weight prep: transpose to (in,out), biases as (1,n) rows,
    tiled positional encoding, head/batch-selector constants, and a lane-padded decoder.
    (At real dims, also cast the large matrices to bf16 / fp8 here.)"""
    def row(v):
        return jnp.asarray(v, jnp.float32).reshape(1, -1)

    def t(w):
        return jnp.asarray(w, jnp.float32).T

    pe_tiled = jnp.tile(make_positional_encoding(S, D_MODEL), (B, 1))  # (B*S, D_MODEL)
    hsel = make_head_selector()
    bsel = make_batch_selector()

    # Zero-pad the decoder to a full 128-lane output block (sliced back in the wrapper).
    wd_pad = jnp.zeros((D_MODEL, OUT_PAD), jnp.float32).at[:, :OUT_TOKENS].set(
        t(params['dec_w']))
    bd_pad = jnp.zeros((1, OUT_PAD), jnp.float32).at[:, :OUT_TOKENS].set(
        row(params['dec_b']))

    # NOTE: attn_wq is intentionally unused -- the only query row is the prepended
    # zero token, whose projection reduces to the bias bq.
    return [
        pe_tiled,
        t(params['embed_w1']), row(params['embed_b1']),
        row(params['embed_ln_g']), row(params['embed_ln_b']),
        t(params['embed_w2']), row(params['embed_b2']),
        row(params['attn_bq']),
        t(params['attn_wk']), row(params['attn_bk']),
        t(params['attn_wv']), row(params['attn_bv']),
        t(params['attn_wo']), row(params['attn_bo']),
        row(params['norm1_g']), row(params['norm1_b']),
        t(params['ffn_w1']), row(params['ffn_b1']),
        t(params['ffn_w2']), row(params['ffn_b2']),
        row(params['norm2_g']), row(params['norm2_b']),
        wd_pad, bd_pad,
        hsel, hsel.T, bsel,
    ]


def transformer_forward(prep, src, mask):
    """src: (S, B, IN_TOKENS) float32, mask: (B, S) bool -> (B, OUT_TOKENS)."""
    # (S, B, IN) -> batch-major token rows (B*S, IN); row b*S+s <- src[s, b].
    src_flat = jnp.transpose(src, (1, 0, 2)).reshape(B * S, IN_TOKENS).astype(jnp.float32)
    # Key-padding mask -> additive bias column (prepended key is never masked,
    # handled analytically inside the kernel).
    mask_bias = jnp.where(mask, NEG_INF, 0.0).astype(jnp.float32).reshape(B * S, 1)

    inputs = (src_flat, mask_bias, *prep)
    # VMEM limit sized from the actual (tiny) buffers, with generous headroom; at real
    # dims this must be re-derived from the bf16/fp8 weight footprint.
    vmem_bytes = sum(int(a.size) * jnp.dtype(a.dtype).itemsize for a in inputs)
    vmem_limit = max(2 * 1024 * 1024, 8 * vmem_bytes)

    out = pl.pallas_call(
        fused_transformer_kernel,
        out_shape=jax.ShapeDtypeStruct((BP, OUT_PAD), jnp.float32),
        in_specs=[pl.BlockSpec(memory_space=pltpu.MemorySpace.VMEM)] * len(inputs),
        out_specs=pl.BlockSpec(memory_space=pltpu.MemorySpace.VMEM),
        compiler_params=pltpu.CompilerParams(vmem_limit_bytes=vmem_limit),
    )(*inputs)
    return out[:B, :OUT_TOKENS]


# ---------------------------------------------------------------------------
# Deterministic parameter initialization (synthetic, matches module structure)
# ---------------------------------------------------------------------------
def init_params(key):
    ks = jax.random.split(key, 20)

    def w(k, shape, fan_in):
        return jax.random.normal(k, shape, jnp.float32) / math.sqrt(fan_in)

    def vec(k, n):
        return 0.1 * jax.random.normal(k, (n,), jnp.float32)

    p = {}
    # embed: Linear(in_tokens, d_embed_ff) -> LayerNorm -> ReLU -> Linear(d_embed_ff, d_model)
    p['embed_w1'] = w(ks[0], (D_EMBED_FF, IN_TOKENS), IN_TOKENS)
    p['embed_b1'] = vec(ks[1], D_EMBED_FF)
    p['embed_ln_g'] = jnp.ones((D_EMBED_FF,), jnp.float32)
    p['embed_ln_b'] = jnp.zeros((D_EMBED_FF,), jnp.float32)
    p['embed_w2'] = w(ks[2], (D_MODEL, D_EMBED_FF), D_EMBED_FF)
    p['embed_b2'] = vec(ks[3], D_MODEL)
    # self-attention (in_proj split into q/k/v; PyTorch stores them stacked)
    p['attn_wq'] = w(ks[4], (D_MODEL, D_MODEL), D_MODEL)   # unused: q row 0 == bq
    p['attn_bq'] = vec(ks[5], D_MODEL)
    p['attn_wk'] = w(ks[6], (D_MODEL, D_MODEL), D_MODEL)
    p['attn_bk'] = vec(ks[7], D_MODEL)
    p['attn_wv'] = w(ks[8], (D_MODEL, D_MODEL), D_MODEL)
    p['attn_bv'] = vec(ks[9], D_MODEL)
    p['attn_wo'] = w(ks[10], (D_MODEL, D_MODEL), D_MODEL)
    p['attn_bo'] = vec(ks[11], D_MODEL)
    p['norm1_g'] = jnp.ones((D_MODEL,), jnp.float32)
    p['norm1_b'] = jnp.zeros((D_MODEL,), jnp.float32)
    # feed-forward (Linear(d_model, d_ff) -> ReLU -> Linear(d_ff, d_model))
    p['ffn_w1'] = w(ks[12], (D_FF, D_MODEL), D_MODEL)
    p['ffn_b1'] = vec(ks[13], D_FF)
    p['ffn_w2'] = w(ks[14], (D_MODEL, D_FF), D_FF)
    p['ffn_b2'] = vec(ks[15], D_MODEL)
    p['norm2_g'] = jnp.ones((D_MODEL,), jnp.float32)
    p['norm2_b'] = jnp.zeros((D_MODEL,), jnp.float32)
    # decoder: Linear(d_model, out_tokens)
    p['dec_w'] = w(ks[16], (OUT_TOKENS, D_MODEL), D_MODEL)
    p['dec_b'] = vec(ks[17], OUT_TOKENS)
    return p


if __name__ == "__main__":
    key = jax.random.PRNGKey(0)
    kp, ksrc, kmask = jax.random.split(key, 3)
    params = init_params(kp)
    prep = prepare_params(params)                 # one-time weight prep (outside jit)

    src = jax.random.normal(ksrc, (S, B, IN_TOKENS), jnp.float32)   # (seq, batch, in_tokens)
    mask = jax.random.bernoulli(kmask, 0.25, (B, S))                # (batch, seq) key padding

    fwd = jax.jit(transformer_forward)
    out = jax.block_until_ready(fwd(prep, src, mask))
    assert out.shape == (B, OUT_TOKENS), out.shape
    assert bool(jnp.all(jnp.isfinite(out)))
    print("KERNEL_OK")
</pallas_src>

<mosaic_0001>
module attributes {stable_mosaic.version = 11 : i64} {
  func.func @fused_transformer_kernel(%arg0: memref<16x24xf32, #tpu.memory_space<vmem>>, %arg1: memref<16x1xf32, #tpu.memory_space<vmem>>, %arg2: memref<16x32xf32, #tpu.memory_space<vmem>>, %arg3: memref<24x48xf32, #tpu.memory_space<vmem>>, %arg4: memref<1x48xf32, #tpu.memory_space<vmem>>, %arg5: memref<1x48xf32, #tpu.memory_space<vmem>>, %arg6: memref<1x48xf32, #tpu.memory_space<vmem>>, %arg7: memref<48x32xf32, #tpu.memory_space<vmem>>, %arg8: memref<1x32xf32, #tpu.memory_space<vmem>>, %arg9: memref<1x32xf32, #tpu.memory_space<vmem>>, %arg10: memref<32x32xf32, #tpu.memory_space<vmem>>, %arg11: memref<1x32xf32, #tpu.memory_space<vmem>>, %arg12: memref<32x32xf32, #tpu.memory_space<vmem>>, %arg13: memref<1x32xf32, #tpu.memory_space<vmem>>, %arg14: memref<32x32xf32, #tpu.memory_space<vmem>>, %arg15: memref<1x32xf32, #tpu.memory_space<vmem>>, %arg16: memref<1x32xf32, #tpu.memory_space<vmem>>, %arg17: memref<1x32xf32, #tpu.memory_space<vmem>>, %arg18: memref<32x32xf32, #tpu.memory_space<vmem>>, %arg19: memref<1x32xf32, #tpu.memory_space<vmem>>, %arg20: memref<32x32xf32, #tpu.memory_space<vmem>>, %arg21: memref<1x32xf32, #tpu.memory_space<vmem>>, %arg22: memref<1x32xf32, #tpu.memory_space<vmem>>, %arg23: memref<1x32xf32, #tpu.memory_space<vmem>>, %arg24: memref<32x128xf32, #tpu.memory_space<vmem>>, %arg25: memref<1x128xf32, #tpu.memory_space<vmem>>, %arg26: memref<32x4xf32, #tpu.memory_space<vmem>>, %arg27: memref<4x32xf32, #tpu.memory_space<vmem>>, %arg28: memref<8x16xf32, #tpu.memory_space<vmem>>, %arg29: memref<8x128xf32, #tpu.memory_space<vmem>>) attributes {dimension_semantics = [], scalar_prefetch = 0 : i64, scratch_operands = 0 : i64, tpu.core_type = #tpu.core_type<tc>} {
    %c0 = arith.constant 0 : index
    %c0_0 = arith.constant 0 : index
    %0 = vector.load %arg0[%c0, %c0_0] : memref<16x24xf32, #tpu.memory_space<vmem>>, vector<16x24xf32>
    %c0_1 = arith.constant 0 : index
    %c0_2 = arith.constant 0 : index
    %1 = vector.load %arg3[%c0_1, %c0_2] : memref<24x48xf32, #tpu.memory_space<vmem>>, vector<24x48xf32>
    %cst = arith.constant dense<0.000000e+00> : vector<16x48xf32>
    %2 = tpu.matmul %0, %1, %cst {dimension_numbers = #tpu.dot_dimension_numbers<[1], [0], [0], [1], [0, 0, 1, 1], [], []>} : vector<16x24xf32>, vector<24x48xf32>, vector<16x48xf32> -> vector<16x48xf32>
    %c0_3 = arith.constant 0 : index
    %c0_4 = arith.constant 0 : index
    %3 = vector.load %arg4[%c0_3, %c0_4] : memref<1x48xf32, #tpu.memory_space<vmem>>, vector<1x48xf32>
    %4 = vector.broadcast %3 : vector<1x48xf32> to vector<16x48xf32>
    %5 = arith.addf %2, %4 : vector<16x48xf32>
    %c0_5 = arith.constant 0 : index
    %c0_6 = arith.constant 0 : index
    %6 = vector.load %arg5[%c0_5, %c0_6] : memref<1x48xf32, #tpu.memory_space<vmem>>, vector<1x48xf32>
    %c0_7 = arith.constant 0 : index
    %c0_8 = arith.constant 0 : index
    %7 = vector.load %arg6[%c0_7, %c0_8] : memref<1x48xf32, #tpu.memory_space<vmem>>, vector<1x48xf32>
    %cst_9 = arith.constant dense<0.000000e+00> : vector<16xf32>
    %8 = vector.multi_reduction <add>, %5, %cst_9 [1] : vector<16x48xf32> to vector<16xf32>
    %9 = vector.shape_cast %8 : vector<16xf32> to vector<16x1xf32>
    %cst_10 = arith.constant 4.800000e+01 : f32
    %10 = vector.broadcast %cst_10 : f32 to vector<16x1xf32>
    %11 = arith.divf %9, %10 : vector<16x1xf32>
    %12 = vector.broadcast %11 : vector<16x1xf32> to vector<16x48xf32>
    %13 = arith.subf %5, %12 : vector<16x48xf32>
    %14 = arith.mulf %13, %13 : vector<16x48xf32>
    %cst_11 = arith.constant dense<0.000000e+00> : vector<16xf32>
    %15 = vector.multi_reduction <add>, %14, %cst_11 [1] : vector<16x48xf32> to vector<16xf32>
    %16 = vector.shape_cast %15 : vector<16xf32> to vector<16x1xf32>
    %cst_12 = arith.constant 4.800000e+01 : f32
    %17 = vector.broadcast %cst_12 : f32 to vector<16x1xf32>
    %18 = arith.divf %16, %17 : vector<16x1xf32>
    %19 = vector.broadcast %11 : vector<16x1xf32> to vector<16x48xf32>
    %20 = arith.subf %5, %19 : vector<16x48xf32>
    %cst_13 = arith.constant 9.99999974E-6 : f32
    %21 = vector.broadcast %cst_13 : f32 to vector<16x1xf32>
    %22 = arith.addf %18, %21 : vector<16x1xf32>
    %23 = math.rsqrt %22 : vector<16x1xf32>
    %24 = vector.broadcast %23 : vector<16x1xf32> to vector<16x48xf32>
    %25 = arith.mulf %20, %24 : vector<16x48xf32>
    %26 = vector.broadcast %6 : vector<1x48xf32> to vector<16x48xf32>
    %27 = arith.mulf %25, %26 : vector<16x48xf32>
    %28 = vector.broadcast %7 : vector<1x48xf32> to vector<16x48xf32>
    %29 = arith.addf %27, %28 : vector<16x48xf32>
    %cst_14 = arith.constant 0.000000e+00 : f32
    %30 = vector.broadcast %cst_14 : f32 to vector<16x48xf32>
    %31 = arith.maximumf %29, %30 : vector<16x48xf32>
    %c0_15 = arith.constant 0 : index
    %c0_16 = arith.constant 0 : index
    %32 = vector.load %arg7[%c0_15, %c0_16] : memref<48x32xf32, #tpu.memory_space<vmem>>, vector<48x32xf32>
    %cst_17 = arith.constant dense<0.000000e+00> : vector<16x32xf32>
    %33 = tpu.matmul %31, %32, %cst_17 {dimension_numbers = #tpu.dot_dimension_numbers<[1], [0], [0], [1], [0, 0, 1, 1], [], []>} : vector<16x48xf32>, vector<48x32xf32>, vector<16x32xf32> -> vector<16x32xf32>
    %c0_18 = arith.constant 0 : index
    %c0_19 = arith.constant 0 : index
    %34 = vector.load %arg8[%c0_18, %c0_19] : memref<1x32xf32, #tpu.memory_space<vmem>>, vector<1x32xf32>
    %35 = vector.broadcast %34 : vector<1x32xf32> to vector<16x32xf32>
    %36 = arith.addf %33, %35 : vector<16x32xf32>
    %c0_20 = arith.constant 0 : index
    %c0_21 = arith.constant 0 : index
    %37 = vector.load %arg2[%c0_20, %c0_21] : memref<16x32xf32, #tpu.memory_space<vmem>>, vector<16x32xf32>
    %38 = arith.addf %36, %37 : vector<16x32xf32>
    %c0_22 = arith.constant 0 : index
    %c0_23 = arith.constant 0 : index
    %39 = vector.load %arg10[%c0_22, %c0_23] : memref<32x32xf32, #tpu.memory_space<vmem>>, vector<32x32xf32>
    %cst_24 = arith.constant dense<0.000000e+00> : vector<16x32xf32>
    %40 = tpu.matmul %38, %39, %cst_24 {dimension_numbers = #tpu.dot_dimension_numbers<[1], [0], [0], [1], [0, 0, 1, 1], [], []>} : vector<16x32xf32>, vector<32x32xf32>, vector<16x32xf32> -> vector<16x32xf32>
    %c0_25 = arith.constant 0 : index
    %c0_26 = arith.constant 0 : index
    %41 = vector.load %arg11[%c0_25, %c0_26] : memref<1x32xf32, #tpu.memory_space<vmem>>, vector<1x32xf32>
    %42 = vector.broadcast %41 : vector<1x32xf32> to vector<16x32xf32>
    %43 = arith.addf %40, %42 : vector<16x32xf32>
    %c0_27 = arith.constant 0 : index
    %c0_28 = arith.constant 0 : index
    %44 = vector.load %arg12[%c0_27, %c0_28] : memref<32x32xf32, #tpu.memory_space<vmem>>, vector<32x32xf32>
    %cst_29 = arith.constant dense<0.000000e+00> : vector<16x32xf32>
    %45 = tpu.matmul %38, %44, %cst_29 {dimension_numbers = #tpu.dot_dimension_numbers<[1], [0], [0], [1], [0, 0, 1, 1], [], []>} : vector<16x32xf32>, vector<32x32xf32>, vector<16x32xf32> -> vector<16x32xf32>
    %c0_30 = arith.constant 0 : index
    %c0_31 = arith.constant 0 : index
    %46 = vector.load %arg13[%c0_30, %c0_31] : memref<1x32xf32, #tpu.memory_space<vmem>>, vector<1x32xf32>
    %47 = vector.broadcast %46 : vector<1x32xf32> to vector<16x32xf32>
    %48 = arith.addf %45, %47 : vector<16x32xf32>
    %c0_32 = arith.constant 0 : index
    %c0_33 = arith.constant 0 : index
    %49 = vector.load %arg9[%c0_32, %c0_33] : memref<1x32xf32, #tpu.memory_space<vmem>>, vector<1x32xf32>
    %c0_34 = arith.constant 0 : index
    %c0_35 = arith.constant 0 : index
    %50 = vector.load %arg26[%c0_34, %c0_35] : memref<32x4xf32, #tpu.memory_space<vmem>>, vector<32x4xf32>
    %c0_36 = arith.constant 0 : index
    %c0_37 = arith.constant 0 : index
    %51 = vector.load %arg27[%c0_36, %c0_37] : memref<4x32xf32, #tpu.memory_space<vmem>>, vector<4x32xf32>
    %c0_38 = arith.constant 0 : index
    %c0_39 = arith.constant 0 : index
    %52 = vector.load %arg28[%c0_38, %c0_39] : memref<8x16xf32, #tpu.memory_space<vmem>>, vector<8x16xf32>
    %53 = vector.broadcast %49 : vector<1x32xf32> to vector<16x32xf32>
    %54 = arith.mulf %53, %43 : vector<16x32xf32>
    %cst_40 = arith.constant dense<0.000000e+00> : vector<16x4xf32>
    %55 = tpu.matmul %54, %50, %cst_40 {dimension_numbers = #tpu.dot_dimension_numbers<[1], [0], [0], [1], [0, 0, 1, 1], [], []>} : vector<16x32xf32>, vector<32x4xf32>, vector<16x4xf32> -> vector<16x4xf32>
    %cst_41 = arith.constant 0.353553385 : f32
    %56 = vector.broadcast %cst_41 : f32 to vector<16x4xf32>
    %57 = arith.mulf %55, %56 : vector<16x4xf32>
    %c0_42 = arith.constant 0 : index
    %c0_43 = arith.constant 0 : index
    %58 = vector.load %arg1[%c0_42, %c0_43] : memref<16x1xf32, #tpu.memory_space<vmem>>, vector<16x1xf32>
    %59 = vector.broadcast %58 : vector<16x1xf32> to vector<16x4xf32>
    %60 = arith.addf %57, %59 : vector<16x4xf32>
    %c0_44 = arith.constant 0 : index
    %c0_45 = arith.constant 0 : index
    %61 = vector.load %arg11[%c0_44, %c0_45] : memref<1x32xf32, #tpu.memory_space<vmem>>, vector<1x32xf32>
    %62 = arith.mulf %49, %61 : vector<1x32xf32>
    %cst_46 = arith.constant dense<0.000000e+00> : vector<1x4xf32>
    %63 = tpu.matmul %62, %50, %cst_46 {dimension_numbers = #tpu.dot_dimension_numbers<[1], [0], [0], [1], [0, 0, 1, 1], [], []>} : vector<1x32xf32>, vector<32x4xf32>, vector<1x4xf32> -> vector<1x4xf32>
    %cst_47 = arith.constant 0.353553385 : f32
    %64 = vector.broadcast %cst_47 : f32 to vector<1x4xf32>
    %65 = arith.mulf %63, %64 : vector<1x4xf32>
    %cst_48 = arith.constant dense<0xFF800000> : vector<4xf32>
    %66 = vector.multi_reduction <maximumf>, %60, %cst_48 [0] : vector<16x4xf32> to vector<4xf32>
    %67 = vector.shape_cast %66 : vector<4xf32> to vector<1x4xf32>
    %68 = arith.maximumf %67, %65 : vector<1x4xf32>
    %69 = vector.broadcast %68 : vector<1x4xf32> to vector<16x4xf32>
    %70 = arith.subf %60, %69 : vector<16x4xf32>
    %71 = math.exp %70 : vector<16x4xf32>
    %72 = arith.subf %65, %68 : vector<1x4xf32>
    %73 = math.exp %72 : vector<1x4xf32>
    %cst_49 = arith.constant dense<0.000000e+00> : vector<8x4xf32>
    %74 = tpu.matmul %52, %71, %cst_49 {dimension_numbers = #tpu.dot_dimension_numbers<[1], [0], [0], [1], [0, 0, 1, 1], [], []>} : vector<8x16xf32>, vector<16x4xf32>, vector<8x4xf32> -> vector<8x4xf32>
    %75 = vector.broadcast %73 : vector<1x4xf32> to vector<8x4xf32>
    %76 = arith.addf %74, %75 : vector<8x4xf32>
    %cst_50 = arith.constant dense<0.000000e+00> : vector<16x32xf32>
    %77 = tpu.matmul %71, %51, %cst_50 {dimension_numbers = #tpu.dot_dimension_numbers<[1], [0], [0], [1], [0, 0, 1, 1], [], []>} : vector<16x4xf32>, vector<4x32xf32>, vector<16x32xf32> -> vector<16x32xf32>
    %78 = arith.mulf %77, %48 : vector<16x32xf32>
    %cst_51 = arith.constant dense<0.000000e+00> : vector<8x32xf32>
    %79 = tpu.matmul %52, %78, %cst_51 {dimension_numbers = #tpu.dot_dimension_numbers<[1], [0], [0], [1], [0, 0, 1, 1], [], []>} : vector<8x16xf32>, vector<16x32xf32>, vector<8x32xf32> -> vector<8x32xf32>
    %cst_52 = arith.constant dense<0.000000e+00> : vector<1x32xf32>
    %80 = tpu.matmul %73, %51, %cst_52 {dimension_numbers = #tpu.dot_dimension_numbers<[1], [0], [0], [1], [0, 0, 1, 1], [], []>} : vector<1x4xf32>, vector<4x32xf32>, vector<1x32xf32> -> vector<1x32xf32>
    %c0_53 = arith.constant 0 : index
    %c0_54 = arith.constant 0 : index
    %81 = vector.load %arg13[%c0_53, %c0_54] : memref<1x32xf32, #tpu.memory_space<vmem>>, vector<1x32xf32>
    %82 = arith.mulf %80, %81 : vector<1x32xf32>
    %83 = vector.broadcast %82 : vector<1x32xf32> to vector<8x32xf32>
    %84 = arith.addf %79, %83 : vector<8x32xf32>
    %cst_55 = arith.constant dense<0.000000e+00> : vector<8x32xf32>
    %85 = tpu.matmul %76, %51, %cst_55 {dimension_numbers = #tpu.dot_dimension_numbers<[1], [0], [0], [1], [0, 0, 1, 1], [], []>} : vector<8x4xf32>, vector<4x32xf32>, vector<8x32xf32> -> vector<8x32xf32>
    %86 = tpu.reciprocal %85 {approx = true} : vector<8x32xf32> -> vector<8x32xf32>
    %87 = arith.mulf %84, %86 : vector<8x32xf32>
    %c0_56 = arith.constant 0 : index
    %c0_57 = arith.constant 0 : index
    %88 = vector.load %arg14[%c0_56, %c0_57] : memref<32x32xf32, #tpu.memory_space<vmem>>, vector<32x32xf32>
    %cst_58 = arith.constant dense<0.000000e+00> : vector<8x32xf32>
    %89 = tpu.matmul %87, %88, %cst_58 {dimension_numbers = #tpu.dot_dimension_numbers<[1], [0], [0], [1], [0, 0, 1, 1], [], []>} : vector<8x32xf32>, vector<32x32xf32>, vector<8x32xf32> -> vector<8x32xf32>
    %c0_59 = arith.constant 0 : index
    %c0_60 = arith.constant 0 : index
    %90 = vector.load %arg15[%c0_59, %c0_60] : memref<1x32xf32, #tpu.memory_space<vmem>>, vector<1x32xf32>
    %91 = vector.broadcast %90 : vector<1x32xf32> to vector<8x32xf32>
    %92 = arith.addf %89, %91 : vector<8x32xf32>
    %c0_61 = arith.constant 0 : index
    %c0_62 = arith.constant 0 : index
    %93 = vector.load %arg16[%c0_61, %c0_62] : memref<1x32xf32, #tpu.memory_space<vmem>>, vector<1x32xf32>
    %c0_63 = arith.constant 0 : index
    %c0_64 = arith.constant 0 : index
    %94 = vector.load %arg17[%c0_63, %c0_64] : memref<1x32xf32, #tpu.memory_space<vmem>>, vector<1x32xf32>
    %cst_65 = arith.constant dense<0.000000e+00> : vector<8xf32>
    %95 = vector.multi_reduction <add>, %92, %cst_65 [1] : vector<8x32xf32> to vector<8xf32>
    %96 = vector.shape_cast %95 : vector<8xf32> to vector<8x1xf32>
    %cst_66 = arith.constant 3.200000e+01 : f32
    %97 = vector.broadcast %cst_66 : f32 to vector<8x1xf32>
    %98 = arith.divf %96, %97 : vector<8x1xf32>
    %99 = vector.broadcast %98 : vector<8x1xf32> to vector<8x32xf32>
    %100 = arith.subf %92, %99 : vector<8x32xf32>
    %101 = arith.mulf %100, %100 : vector<8x32xf32>
    %cst_67 = arith.constant dense<0.000000e+00> : vector<8xf32>
    %102 = vector.multi_reduction <add>, %101, %cst_67 [1] : vector<8x32xf32> to vector<8xf32>
    %103 = vector.shape_cast %102 : vector<8xf32> to vector<8x1xf32>
    %cst_68 = arith.constant 3.200000e+01 : f32
    %104 = vector.broadcast %cst_68 : f32 to vector<8x1xf32>
    %105 = arith.divf %103, %104 : vector<8x1xf32>
    %106 = vector.broadcast %98 : vector<8x1xf32> to vector<8x32xf32>
    %107 = arith.subf %92, %106 : vector<8x32xf32>
    %cst_69 = arith.constant 9.99999974E-6 : f32
    %108 = vector.broadcast %cst_69 : f32 to vector<8x1xf32>
    %109 = arith.addf %105, %108 : vector<8x1xf32>
    %110 = math.rsqrt %109 : vector<8x1xf32>
    %111 = vector.broadcast %110 : vector<8x1xf32> to vector<8x32xf32>
    %112 = arith.mulf %107, %111 : vector<8x32xf32>
    %113 = vector.broadcast %93 : vector<1x32xf32> to vector<8x32xf32>
    %114 = arith.mulf %112, %113 : vector<8x32xf32>
    %115 = vector.broadcast %94 : vector<1x32xf32> to vector<8x32xf32>
    %116 = arith.addf %114, %115 : vector<8x32xf32>
    %c0_70 = arith.constant 0 : index
    %c0_71 = arith.constant 0 : index
    %117 = vector.load %arg18[%c0_70, %c0_71] : memref<32x32xf32, #tpu.memory_space<vmem>>, vector<32x32xf32>
    %cst_72 = arith.constant dense<0.000000e+00> : vector<8x32xf32>
    %118 = tpu.matmul %116, %117, %cst_72 {dimension_numbers = #tpu.dot_dimension_numbers<[1], [0], [0], [1], [0, 0, 1, 1], [], []>} : vector<8x32xf32>, vector<32x32xf32>, vector<8x32xf32> -> vector<8x32xf32>
    %c0_73 = arith.constant 0 : index
    %c0_74 = arith.constant 0 : index
    %119 = vector.load %arg19[%c0_73, %c0_74] : memref<1x32xf32, #tpu.memory_space<vmem>>, vector<1x32xf32>
    %120 = vector.broadcast %119 : vector<1x32xf32> to vector<8x32xf32>
    %121 = arith.addf %118, %120 : vector<8x32xf32>
    %cst_75 = arith.constant 0.000000e+00 : f32
    %122 = vector.broadcast %cst_75 : f32 to vector<8x32xf32>
    %123 = arith.maximumf %121, %122 : vector<8x32xf32>
    %c0_76 = arith.constant 0 : index
    %c0_77 = arith.constant 0 : index
    %124 = vector.load %arg20[%c0_76, %c0_77] : memref<32x32xf32, #tpu.memory_space<vmem>>, vector<32x32xf32>
    %cst_78 = arith.constant dense<0.000000e+00> : vector<8x32xf32>
    %125 = tpu.matmul %123, %124, %cst_78 {dimension_numbers = #tpu.dot_dimension_numbers<[1], [0], [0], [1], [0, 0, 1, 1], [], []>} : vector<8x32xf32>, vector<32x32xf32>, vector<8x32xf32> -> vector<8x32xf32>
    %c0_79 = arith.constant 0 : index
    %c0_80 = arith.constant 0 : index
    %126 = vector.load %arg21[%c0_79, %c0_80] : memref<1x32xf32, #tpu.memory_space<vmem>>, vector<1x32xf32>
    %127 = vector.broadcast %126 : vector<1x32xf32> to vector<8x32xf32>
    %128 = arith.addf %125, %127 : vector<8x32xf32>
    %129 = arith.addf %116, %128 : vector<8x32xf32>
    %c0_81 = arith.constant 0 : index
    %c0_82 = arith.constant 0 : index
    %130 = vector.load %arg22[%c0_81, %c0_82] : memref<1x32xf32, #tpu.memory_space<vmem>>, vector<1x32xf32>
    %c0_83 = arith.constant 0 : index
    %c0_84 = arith.constant 0 : index
    %131 = vector.load %arg23[%c0_83, %c0_84] : memref<1x32xf32, #tpu.memory_space<vmem>>, vector<1x32xf32>
    %cst_85 = arith.constant dense<0.000000e+00> : vector<8xf32>
    %132 = vector.multi_reduction <add>, %129, %cst_85 [1] : vector<8x32xf32> to vector<8xf32>
    %133 = vector.shape_cast %132 : vector<8xf32> to vector<8x1xf32>
    %cst_86 = arith.constant 3.200000e+01 : f32
    %134 = vector.broadcast %cst_86 : f32 to vector<8x1xf32>
    %135 = arith.divf %133, %134 : vector<8x1xf32>
    %136 = vector.broadcast %135 : vector<8x1xf32> to vector<8x32xf32>
    %137 = arith.subf %129, %136 : vector<8x32xf32>
    %138 = arith.mulf %137, %137 : vector<8x32xf32>
    %cst_87 = arith.constant dense<0.000000e+00> : vector<8xf32>
    %139 = vector.multi_reduction <add>, %138, %cst_87 [1] : vector<8x32xf32> to vector<8xf32>
    %140 = vector.shape_cast %139 : vector<8xf32> to vector<8x1xf32>
    %cst_88 = arith.constant 3.200000e+01 : f32
    %141 = vector.broadcast %cst_88 : f32 to vector<8x1xf32>
    %142 = arith.divf %140, %141 : vector<8x1xf32>
    %143 = vector.broadcast %135 : vector<8x1xf32> to vector<8x32xf32>
    %144 = arith.subf %129, %143 : vector<8x32xf32>
    %cst_89 = arith.constant 9.99999974E-6 : f32
    %145 = vector.broadcast %cst_89 : f32 to vector<8x1xf32>
    %146 = arith.addf %142, %145 : vector<8x1xf32>
    %147 = math.rsqrt %146 : vector<8x1xf32>
    %148 = vector.broadcast %147 : vector<8x1xf32> to vector<8x32xf32>
    %149 = arith.mulf %144, %148 : vector<8x32xf32>
    %150 = vector.broadcast %130 : vector<1x32xf32> to vector<8x32xf32>
    %151 = arith.mulf %149, %150 : vector<8x32xf32>
    %152 = vector.broadcast %131 : vector<1x32xf32> to vector<8x32xf32>
    %153 = arith.addf %151, %152 : vector<8x32xf32>
    %c0_90 = arith.constant 0 : index
    %c0_91 = arith.constant 0 : index
    %154 = vector.load %arg24[%c0_90, %c0_91] : memref<32x128xf32, #tpu.memory_space<vmem>>, vector<32x128xf32>
    %cst_92 = arith.constant dense<0.000000e+00> : vector<8x128xf32>
    %155 = tpu.matmul %153, %154, %cst_92 {dimension_numbers = #tpu.dot_dimension_numbers<[1], [0], [0], [1], [0, 0, 1, 1], [], []>} : vector<8x32xf32>, vector<32x128xf32>, vector<8x128xf32> -> vector<8x128xf32>
    %c0_93 = arith.constant 0 : index
    %c0_94 = arith.constant 0 : index
    %156 = vector.load %arg25[%c0_93, %c0_94] : memref<1x128xf32, #tpu.memory_space<vmem>>, vector<1x128xf32>
    %157 = vector.broadcast %156 : vector<1x128xf32> to vector<8x128xf32>
    %158 = arith.addf %155, %157 : vector<8x128xf32>
    %c0_95 = arith.constant 0 : index
    %c0_96 = arith.constant 0 : index
    %159 = vector.load %arg29[%c0_95, %c0_96] : memref<8x128xf32, #tpu.memory_space<vmem>>, vector<8x128xf32>
    tpu.vector_store %arg29[%c0_95, %c0_96], %158 {strides = array<i32>} : memref<8x128xf32, #tpu.memory_space<vmem>>, vector<8x128xf32>,
    return
  }
}

</mosaic_0001>

<bundles_post_ra>
// kernel: transformer_forward.1
= control target key start
LH: loop header
LB: loop body
LE: loop exit
PB: predicated region body
PF: predicated region fallthrough
CT: control target
= control target key end

     0   :  { %s2276_s6 = smov 1   ;;  %s2277_s10 = smov 2   ;;  %s2653_s0 = inlined_call_operand.smem [shape: u32[30], index: -1, kind: input, shape index: {}] }
   0x1   :  { %s2328_s5 = sld [smem:[%s2653_s0]]   ;;  %s2278_s14 = smov 3  }
   0x2   :  { %s2333_s9 = sld [smem:[%s2653_s0 + %s2276_s6]]   ;;  %s2279_s18 = smov 4  }
   0x3   :  { %s2338_s13 = sld [smem:[%s2653_s0 + %s2277_s10]]   ;;  %s2280_s22 = smov 5  }
   0x4   :  { %s2343_s17 = sld [smem:[%s2653_s0 + %s2278_s14]]   ;;  %s2281_s26 = smov 6  }
   0x5   :  { %s2348_s21 = sld [smem:[%s2653_s0 + %s2279_s18]]   ;;  %s2282_s30 = smov 7  }
   0x6   :  { %s2353_s25 = sld [smem:[%s2653_s0 + %s2280_s22]]   ;;  %s2283_s4 = smov 8  }
   0x7   :  { %s2358_s29 = sld [smem:[%s2653_s0 + %s2281_s26]]   ;;  %s2284_s10 = smov 9  }
   0x8   :  { %2659 = sst [smem:[#allocation21_spill]] %s2333_s9  ;;  %s2285_s15 = smov 10  }
   0x9   :  { %s2363_s3 = sld [smem:[%s2653_s0 + %s2282_s30]]   ;;  %s2286_s20 = smov 11  }
   0xa   :  { %s2368_s8 = sld [smem:[%s2653_s0 + %s2283_s4]]   ;;  %s2287_s26 = smov 12  }
   0xb   :  { %s2373_s14 = sld [smem:[%s2653_s0 + %s2284_s10]]   ;;  %s2288_s1 = smov 13  }
   0xc   :  { %s2378_s19 = sld [smem:[%s2653_s0 + %s2285_s15]]   ;;  %s2289_s7 = smov 14  }
   0xd   :  { %s2383_s24 = sld [smem:[%s2653_s0 + %s2286_s20]]   ;;  %s2290_s15 = smov 15  }
   0xe   :  { %s2388_s30 = sld [smem:[%s2653_s0 + %s2287_s26]]   ;;  %s2291_s22 = smov 16  }
   0xf   :  { %s2393_s6 = sld [smem:[%s2653_s0 + %s2288_s1]]   ;;  %s2292_s28 = smov 17  }
  0x10   :  { %s2398_s12 = sld [smem:[%s2653_s0 + %s2289_s7]]   ;;  %s2293_s7 = smov 18  }
  0x11   :  { %2660 = sst [smem:[#allocation22_spill]] %s2373_s14 }
  0x12   :  { %s2403_s20 = sld [smem:[%s2653_s0 + %s2290_s15]]   ;;  %s2294_s15 = smov 19  }
  0x13   :  { %s2408_s27 = sld [smem:[%s2653_s0 + %s2291_s22]]   ;;  %s2295_s22 = smov 20  }
  0x14   :  { %s2413_s4 = sld [smem:[%s2653_s0 + %s2292_s28]]   ;;  %s2296_s28 = smov 21  }
  0x15   :  { %s2423_s14 = sld [smem:[%s2653_s0 + %s2294_s15]]   ;;  %s2298_s15 = smov 23  }
  0x16   :  { %2661 = sst [smem:[#allocation23_spill]] %s2398_s12 }
  0x17   :  { %s2418_s12 = sld [smem:[%s2653_s0 + %s2293_s7]]   ;;  %s2297_s7 = smov 22  }
  0x18   :  { %s2428_s9 = sld [smem:[%s2653_s0 + %s2295_s22]]   ;;  %s2299_s22 = smov 24  }
  0x1a   :  { %2662 = sst [smem:[#allocation24_spill]] %s2413_s4 }
  0x1b   :  { %2664 = sst [smem:[#allocation26_spill]] %s2423_s14 }
  0x1c   :  { %s2433_s4 = sld [smem:[%s2653_s0 + %s2296_s28]]   ;;  %s2300_s28 = smov 25  }
  0x1d   :  { %2663 = sst [smem:[#allocation25_spill]] %s2418_s12 }
  0x1e   :  { %2665 = sst [smem:[#allocation27_spill]] %s2428_s9 }
  0x1f   :  { %s2438_s12 = sld [smem:[%s2653_s0 + %s2297_s7]]   ;;  %s2301_s7 = smov 26  }
  0x20   :  { %s2443_s14 = sld [smem:[%s2653_s0 + %s2298_s15]]   ;;  %s2302_s15 = smov 27  }
  0x21   :  { %s2448_s9 = sld [smem:[%s2653_s0 + %s2299_s22]]   ;;  %s2303_s22 = smov 28  }
  0x22   :  { %2666 = sst [smem:[#allocation28_spill]] %s2433_s4 }
  0x23   :  { %s2453_s4 = sld [smem:[%s2653_s0 + %s2300_s28]]   ;;  %s2304_s28 = smov 29  }
  0x25   :  { %2667 = sst [smem:[#allocation29_spill]] %s2438_s12 }
  0x26   :  { %2668 = sst [smem:[#allocation30_spill]] %s2443_s14 }
  0x27   :  { %2669 = sst [smem:[#allocation31_spill]] %s2448_s9 }
  0x28   :  { %s2458_s12 = sld [smem:[%s2653_s0 + %s2301_s7]]  }
  0x29   :  { %2670 = sst [smem:[#allocation32_spill]] %s2453_s4 }
  0x2a   :  { %s2463_s14 = sld [smem:[%s2653_s0 + %s2302_s15]]  }
  0x2b   :  { %s2468_s9 = sld [smem:[%s2653_s0 + %s2303_s22]]  }
  0x2c   :  { %s2473_s4 = sld [smem:[%s2653_s0 + %s2304_s28]]  }
  0x2d   :  { %64 = vsyncpa [#allocation3], 0 }
  0x2e   :  { %65 = vsyncpa [#allocation5], 0 }
  0x2f   :  { %66 = vsyncpa [#allocation8], 0 }
  0x30   :  { %67 = vsyncpa [#allocation11], 0 }
  0x31   :  { %68 = vsyncpa [#allocation14], 0  ;;  %s2305_s7 = smov [#allocation4]   ;;  %s2306_s11 = smov [#allocation7]  }
  0x32   :  { %s90_s10 = sshll.u32 %s2305_s7, 4  ;;  %s113_s15 = sshll.u32 %s2306_s11, 4  ;;  %s91_s10 = int_to_ptr.vmem [resolvable:$true] %s90_s10  ;;  %s2475_s15 = int_to_ptr.vmem [resolvable:$true] %s113_s15 }
  0x33   :  { %s2068_s16 = scalar_lea.hbm %s2343_s17, 384 }
  0x34   :  { %p2069_p0 = scmp.ne.s32.totalorder %s2343_s17, %s2068_s16  ;;  %p2072_p1 = scmp.lt.u32.totalorder %s2068_s16, %s2343_s17 }
  0x36   :  { %p2074_p2 = pnand %p2072_p1, %p2069_p0 }
  0x38   :  { %2077 = shalt.err (!%p2074_p2)
}
  0x39   :  { %s2078_s0 = scalar_lea.vmem %s91_s10, 384  ;;  %p2083_p4 = scmp.lt.s32.totalorder %s91_s10, %s91_s10 }
  0x3a   :  { %p2079_p3 = scmp.ne.s32.totalorder %s91_s10, %s2078_s0  ;;  %p2084_p5 = scmp.lt.s32.totalorder %s2078_s0, %s2078_s0 }
  0x3c   :  { %p2085_p6 = por %p2084_p5, %p2083_p4 }
  0x3e   :  { %p2086_p7 = pnand %p2085_p6, %p2079_p3 }
  0x40   :  { %2089 = shalt.err (!%p2086_p7)
}
  0x41   :  { %s2307_s18 = smov 128   ;;  %s2308_s22 = smov 8  }
  0x42   :  { %96 = dma.hbm_to_vmem [thread:$0]  %s2343_s17, 384, %s91_s10, [#allocation5], %s2307_s18, %s2307_s18, %s2308_s22  }
  0x43   :  { %s2090_s23 = scalar_lea.hbm %s2353_s25, 16 }
  0x44   :  { %p2091_p8 = scmp.ne.s32.totalorder %s2353_s25, %s2090_s23  ;;  %p2094_p9 = scmp.lt.u32.totalorder %s2090_s23, %s2353_s25 }
  0x46   :  { %p2096_p10 = pnand %p2094_p9, %p2091_p8 }
  0x48   :  { %2099 = shalt.err (!%p2096_p10)
}
  0x49   :  { %s2100_s26 = scalar_lea.vmem %s2475_s15, 16  ;;  %s2104_s28 = scalar_lea.vmem %s2475_s15, 32 }
  0x4a   :  { %p2101_p11 = scmp.ne.s32.totalorder %s2475_s15, %s2100_s26  ;;  %p2105_p12 = scmp.lt.s32.totalorder %s2475_s15, %s2475_s15 }
  0x4b   :  { %p2106_p13 = scmp.lt.s32.totalorder %s2104_s28, %s2100_s26 }
  0x4d   :  { %p2107_p0 = por %p2106_p13, %p2105_p12 }
  0x4f   :  { %p2108_p1 = pnand %p2107_p0, %p2101_p11 }
  0x51   :  { %2111 = shalt.err (!%p2108_p1)
}
  0x52   :  { %116 = dma.hbm_to_vmem [thread:$0]  %s2353_s25, 16, %s2475_s15, [#allocation8]  }
  0x53   :  { %s2309_s17 = smov [#allocation10]   ;;  %s2310_s2 = smov [#allocation13]  }
  0x54   :  { %s141_s1 = sshll.u32 %s2309_s17, 4  ;;  %s165_s7 = sshll.u32 %s2310_s2, 4  ;;  %s142_s1 = int_to_ptr.vmem [resolvable:$true] %s141_s1  ;;  %s166_s7 = int_to_ptr.vmem [resolvable:$true] %s165_s7 }
  0x55   :  { %s2112_s10 = scalar_lea.hbm %s2383_s24, 16 }
  0x56   :  { %p2113_p2 = scmp.ne.s32.totalorder %s2383_s24, %s2112_s10  ;;  %p2116_p3 = scmp.lt.u32.totalorder %s2112_s10, %s2383_s24 }
  0x58   :  { %p2118_p4 = pnand %p2116_p3, %p2113_p2 }
  0x5a   :  { %2121 = shalt.err (!%p2118_p4)
}
  0x5b   :  { %s2122_s11 = scalar_lea.vmem %s142_s1, 16  ;;  %s2126_s16 = scalar_lea.vmem %s142_s1, 32 }
  0x5c   :  { %p2123_p5 = scmp.ne.s32.totalorder %s142_s1, %s2122_s11  ;;  %p2127_p6 = scmp.lt.s32.totalorder %s142_s1, %s142_s1 }
  0x5d   :  { %p2128_p7 = scmp.lt.s32.totalorder %s2126_s16, %s2122_s11 }
  0x5f   :  { %p2129_p8 = por %p2128_p7, %p2127_p6 }
  0x61   :  { %p2130_p9 = pnand %p2129_p8, %p2123_p5 }
  0x63   :  { %2133 = shalt.err (!%p2130_p9)
}
  0x64   :  { %144 = dma.hbm_to_vmem [thread:$0]  %s2383_s24, 16, %s142_s1, [#allocation11]  }
  0x65   :  { %s2134_s25 = scalar_lea.hbm %s2403_s20, 16 }
  0x66   :  { %p2135_p10 = scmp.ne.s32.totalorder %s2403_s20, %s2134_s25  ;;  %p2138_p11 = scmp.lt.u32.totalorder %s2134_s25, %s2403_s20 }
  0x68   :  { %p2140_p12 = pnand %p2138_p11, %p2135_p10 }
  0x6a   :  { %2143 = shalt.err (!%p2140_p12)
}
  0x6b   :  { %s2144_s15 = scalar_lea.vmem %s166_s7, 16  ;;  %s2148_s0 = scalar_lea.vmem %s166_s7, 32 }
  0x6c   :  { %p2145_p13 = scmp.ne.s32.totalorder %s166_s7, %s2144_s15  ;;  %p2149_p0 = scmp.lt.s32.totalorder %s166_s7, %s166_s7 }
  0x6d   :  { %p2150_p1 = scmp.lt.s32.totalorder %s2148_s0, %s2144_s15 }
  0x6f   :  { %p2151_p2 = por %p2150_p1, %p2149_p0 }
  0x71   :  { %p2152_p3 = pnand %p2151_p2, %p2145_p13 }
  0x73   :  { %2155 = shalt.err (!%p2152_p3)
}
  0x74   :  { %168 = dma.hbm_to_vmem [thread:$0]  %s2403_s20, 16, %s166_s7, [#allocation14]  }
  0x75   :  { %s2311_s23 = smov [#allocation2]   ;;  %s2312_s26 = smov [#allocation6]  }
  0x76   :  { %s78_s24 = sshll.u32 %s2311_s23, 4  ;;  %s103_s28 = sshll.u32 %s2312_s26, 4  ;;  %s79_s24 = int_to_ptr.vmem [resolvable:$true] %s78_s24  ;;  %s104_s28 = int_to_ptr.vmem [resolvable:$true] %s103_s28 }
  0x77   :  { %s2156_s17 = scalar_lea.hbm %s2338_s13, 256 }
  0x78   :  { %p2157_p4 = scmp.ne.s32.totalorder %s2338_s13, %s2156_s17  ;;  %p2160_p5 = scmp.lt.u32.totalorder %s2156_s17, %s2338_s13 }
  0x7a   :  { %p2162_p6 = pnand %p2160_p5, %p2157_p4 }
  0x7c   :  { %2165 = shalt.err (!%p2162_p6)
}
  0x7d   :  { %s2166_s1 = scalar_lea.vmem %s79_s24, 256  ;;  %p2171_p8 = scmp.lt.s32.totalorder %s79_s24, %s79_s24 }
  0x7e   :  { %p2167_p7 = scmp.ne.s32.totalorder %s79_s24, %s2166_s1  ;;  %p2172_p9 = scmp.lt.s32.totalorder %s2166_s1, %s2166_s1 }
  0x80   :  { %p2173_p10 = por %p2172_p9, %p2171_p8 }
  0x82   :  { %p2174_p11 = pnand %p2173_p10, %p2167_p7 }
  0x84   :  { %2177 = shalt.err (!%p2174_p11)
}
  0x85   :  { %84 = dma.hbm_to_vmem [thread:$0]  %s2338_s13, 256, %s79_s24, [#allocation3], %s2307_s18, %s2307_s18, %s2308_s22  }
  0x86   :  { %s2178_s20 = scalar_lea.hbm %s2348_s21, 16 }
  0x87   :  { %p2179_p12 = scmp.ne.s32.totalorder %s2348_s21, %s2178_s20  ;;  %p2182_p13 = scmp.lt.u32.totalorder %s2178_s20, %s2348_s21 }
  0x89   :  { %p2184_p0 = pnand %p2182_p13, %p2179_p12 }
  0x8b   :  { %2187 = shalt.err (!%p2184_p0)
}
  0x8c   :  { %s2188_s2 = scalar_lea.vmem %s104_s28, 16  ;;  %s2192_s7 = scalar_lea.vmem %s104_s28, 32 }
  0x8d   :  { %p2189_p1 = scmp.ne.s32.totalorder %s104_s28, %s2188_s2  ;;  %p2193_p2 = scmp.lt.s32.totalorder %s104_s28, %s104_s28 }
  0x8e   :  { %p2194_p3 = scmp.lt.s32.totalorder %s2192_s7, %s2188_s2 }
  0x90   :  { %p2195_p4 = por %p2194_p3, %p2193_p2 }
  0x92   :  { %p2196_p5 = pnand %p2195_p4, %p2189_p1 }
  0x94   :  { %2199 = shalt.err (!%p2196_p5)
}
  0x95   :  { %106 = dma.hbm_to_vmem [thread:$0]  %s2348_s21, 16, %s104_s28, [#allocation5]  }
  0x96   :  { %s2313_s10 = smov [#allocation9]   ;;  %s2314_s18 = smov [#allocation12]  }
  0x97   :  { %s123_s13 = sshll.u32 %s2313_s10, 4  ;;  %s153_s22 = sshll.u32 %s2314_s18, 4  ;;  %s124_s13 = int_to_ptr.vmem [resolvable:$true] %s123_s13  ;;  %s154_s22 = int_to_ptr.vmem [resolvable:$true] %s153_s22 }
  0x98   :  { %s2200_s11 = scalar_lea.hbm %s2358_s29, 16 }
  0x99   :  { %p2201_p6 = scmp.ne.s32.totalorder %s2358_s29, %s2200_s11  ;;  %p2204_p7 = scmp.lt.u32.totalorder %s2200_s11, %s2358_s29 }
  0x9b   :  { %p2206_p8 = pnand %p2204_p7, %p2201_p6 }
  0x9d   :  { %2209 = shalt.err (!%p2206_p8)
}
  0x9e   :  { %s2210_s16 = scalar_lea.vmem %s124_s13, 16  ;;  %s2214_s25 = scalar_lea.vmem %s124_s13, 32 }
  0x9f   :  { %p2211_p9 = scmp.ne.s32.totalorder %s124_s13, %s2210_s16  ;;  %p2215_p10 = scmp.lt.s32.totalorder %s124_s13, %s124_s13 }
  0xa0   :  { %p2216_p11 = scmp.lt.s32.totalorder %s2214_s25, %s2210_s16 }
  0xa2   :  { %p2217_p12 = por %p2216_p11, %p2215_p10 }
  0xa4   :  { %p2218_p13 = pnand %p2217_p12, %p2211_p9 }
  0xa6   :  { %2221 = shalt.err (!%p2218_p13)
}
  0xa7   :  { %126 = dma.hbm_to_vmem [thread:$0]  %s2358_s29, 16, %s124_s13, [#allocation8]  }
  0xa8   :  { %s2222_s21 = scalar_lea.hbm %s2393_s6, 16 }
  0xa9   :  { %p2223_p0 = scmp.ne.s32.totalorder %s2393_s6, %s2222_s21  ;;  %p2226_p1 = scmp.lt.u32.totalorder %s2222_s21, %s2393_s6 }
  0xab   :  { %p2228_p2 = pnand %p2226_p1, %p2223_p0 }
  0xad   :  { %2231 = shalt.err (!%p2228_p2)
}
  0xae   :  { %s2232_s15 = scalar_lea.vmem %s154_s22, 16  ;;  %s2236_s0 = scalar_lea.vmem %s154_s22, 32 }
  0xaf   :  { %p2233_p3 = scmp.ne.s32.totalorder %s154_s22, %s2232_s15  ;;  %p2237_p4 = scmp.lt.s32.totalorder %s154_s22, %s154_s22 }
  0xb0   :  { %p2238_p5 = scmp.lt.s32.totalorder %s2236_s0, %s2232_s15 }
  0xb2   :  { %p2239_p6 = por %p2238_p5, %p2237_p4 }
  0xb4   :  { %p2240_p7 = pnand %p2239_p6, %p2233_p3 }
  0xb6   :  { %2243 = shalt.err (!%p2240_p7)
}
  0xb7   :  { %156 = dma.hbm_to_vmem [thread:$0]  %s2393_s6, 16, %s154_s22, [#allocation11]  }
  0xb8   :  { %s2315_s23 = smov [#allocation15]   ;;  %s2244_s24 = scalar_lea.hbm %s2408_s27, 16 }
  0xb9   :  { %s175_s29 = sshll.u32 %s2315_s23, 4  ;;  %p2245_p8 = scmp.ne.s32.totalorder %s2408_s27, %s2244_s24  ;;  %s176_s29 = int_to_ptr.vmem [resolvable:$true] %s175_s29 }
  0xba   :  { %p2248_p9 = scmp.lt.u32.totalorder %s2244_s24, %s2408_s27 }
  0xbc   :  { %p2250_p10 = pnand %p2248_p9, %p2245_p8 }
  0xbe   :  { %2253 = shalt.err (!%p2250_p10)
}
  0xbf   :  { %s2254_s26 = scalar_lea.vmem %s176_s29, 16  ;;  %s2258_s28 = scalar_lea.vmem %s176_s29, 32 }
  0xc0   :  { %p2255_p11 = scmp.ne.s32.totalorder %s176_s29, %s2254_s26  ;;  %p2259_p12 = scmp.lt.s32.totalorder %s176_s29, %s176_s29 }
  0xc1   :  { %p2260_p13 = scmp.lt.s32.totalorder %s2258_s28, %s2254_s26 }
  0xc3   :  { %p2261_p0 = por %p2260_p13, %p2259_p12 }
  0xc5   :  { %p2262_p1 = pnand %p2261_p0, %p2255_p11 }
  0xc7   :  { %2265 = shalt.err (!%p2262_p1)
}
  0xc8   :  { %178 = dma.hbm_to_vmem [thread:$0]  %s2408_s27, 16, %s176_s29, [#allocation14]  }
  0xc9   :  { %2266 = dma.done.wait [#allocation3], 256  }
  0xca   :  { %2267 = vsyncadd [#allocation3], 4294967040 }
  0xcb   :  { %2268 = dma.done.wait [#allocation5], 400  }
  0xcc   :  { %2269 = vsyncadd [#allocation5], 4294966896 }
  0xcd   :  { %2270 = dma.done.wait [#allocation8], 32  }
  0xce   :  { %2271 = vsyncadd [#allocation8], 4294967264 }
  0xcf   :  { %2272 = dma.done.wait [#allocation11], 32  }
  0xd0   :  { %2273 = vsyncadd [#allocation11], 4294967264 }
  0xd1   :  { %2274 = dma.done.wait [#allocation14], 32  }
  0xd2   :  { %2275 = vsyncadd [#allocation14], 4294967264  ;;  %vm242_vm0 = vcmask 195584   ;;  %v232_v0 = vld [vmem:[#allocation4] sm:$0xff]  ;;  %v233_v1 = vld [vmem:[#allocation4 + $0x8] sm:$0xff]  ;;  %vm326_vm1 = vcmask 392192  }
  0xd3   :  { %v1930_v2 = vpack.c.bf16 %v233_v1, %v232_v0  ;;  %v230_v3 = vld [vmem:[%s2328_s5] sm:$0xff]  ;;  %v231_v5 = vld [vmem:[%s2328_s5 + $0x8] sm:$0xff]  ;;  %v374_v25 = vld [vmem:[%s2363_s3 + $0x10] sm:$0xff]  ;;  %vm481_vm2 = vcmask 261120   ;;  %s2671_s5 = sld [smem:[#allocation21_spill]]  ;;  %vm2317_vm3 = vmmov 0  }
  0xd4   :  { %v234_v4 = vld [vmem:[#allocation4 + $0x10] sm:$0xff]  ;;  %1795 = vmatprep.mubr.msk.f32.mxu0 %vm242_vm0, %v230_v3  ;;  %v1684_v6 = vld [vmem:[#allocation6] ss:$0 sm:$0xff]  ;;  %v375_v27 = vld [vmem:[%s2363_s3 + $0x18] sm:$0xff]  ;;  %vm944_vm4 = vcmask 1043456   ;;  %vm836_vm5 = vcmask 31744  }
  0xd5   :  { %1931 = vmatprep.subr.bf16.mxu0 %v1930_v2  ;;  %v372_v23 = vld [vmem:[%s2363_s3] sm:$0xff]  ;;  %v373_v24 = vld [vmem:[%s2363_s3 + $0x8] sm:$0xff]  ;;  %v1938_v28 = vpack.c.bf16 %v375_v27, %v374_v25  ;;  %v472_v56 = vld [vmem:[%s2378_s19 + $0x10] sm:$0xff]  ;;  %vm864_vm6 = vcmask 130048   ;;  %s2678_s6 = sld [smem:[#allocation28_spill]]  ;;  %s2680_s27 = sld [smem:[#allocation29_spill]] }
  0xd6   :  { %1933 = vmatpush3.bf16.msra.mxu0 %v1930_v2  ;;  %v1934_v26 = vpack.c.bf16 %v373_v24, %v372_v23  ;;  %v376_v29 = vld [vmem:[%s2363_s3 + $0x20] sm:$0xff]  ;;  %v377_v30 = vld [vmem:[%s2363_s3 + $0x28] sm:$0xff]  ;;  %v473_v57 = vld [vmem:[%s2378_s19 + $0x18] sm:$0xff]  ;;  %s2672_s3 = sld [smem:[#allocation22_spill]]  ;;  %s2682_s1 = sld [smem:[#allocation32_spill]] }
  0xd7   :  { %1793 = vmatprep.subr.mxu0 %v234_v4  ;;  %v1942_v31 = vpack.c.bf16 %v377_v30, %v376_v29  ;;  %v470_v32 = vld [vmem:[%s2378_s19] sm:$0xff]  ;;  %v471_v33 = vld [vmem:[%s2378_s19 + $0x8] sm:$0xff]  ;;  %v1950_v58 = vpack.c.bf16 %v473_v57, %v472_v56  ;;  %v565_v59 = vld [vmem:[%s2388_s30 + $0x10] sm:$0xff]  ;;  %s2676_s19 = sld [smem:[#allocation24_spill]]  ;;  %s2681_s17 = sld [smem:[#allocation30_spill]] }
  0xd8   :  { %1935 = vmatprep.subr.bf16.mxu1 %v1934_v26  ;;  %v563_v34 = vld [vmem:[%s2388_s30] sm:$0xff]  ;;  %v1946_v35 = vpack.c.bf16 %v471_v33, %v470_v32  ;;  %v564_v36 = vld [vmem:[%s2388_s30 + $0x8] sm:$0xff]  ;;  %v566_v60 = vld [vmem:[%s2388_s30 + $0x18] sm:$0xff]  ;;  %s2677_s30 = sld [smem:[#allocation26_spill]] }
  0xd9   :  { %1937 = vmatpush3.bf16.msra.mxu1 %v1934_v26  ;;  %v1954_v37 = vpack.c.bf16 %v564_v36, %v563_v34  ;;  %v1687_v45 = vld [vmem:[#allocation7] ss:$0 sm:$0xff]  ;;  %v1688_v47 = vld [vmem:[#allocation9] ss:$0 sm:$0xff]  ;;  %v1958_v61 = vpack.c.bf16 %v566_v60, %v565_v59  ;;  %v650_v62 = vld [vmem:[%s2458_s12] sm:$0xff] }
  0xda   :  { %1794 = vmatpush3.msra.mxu0 %v234_v4  ;;  %1939 = vmatprep.subr.bf16.mxu1 %v1938_v28  ;;  %v651_v63 = vld [vmem:[%s2458_s12 + $0x8] sm:$0xff]  ;;  %v1689_v1 = vld [vmem:[%s2368_s8] ss:$0 sm:$0xff]  ;;  %s2674_s8 = sld [smem:[#allocation25_spill]] }
  0xdb   :  { %1796 = vmatmul.mubr.msk.f32.vlgmr.msra.gmra.mrb[0].mxu0 %vm242_vm0, %v231_v5  ;;  %1947 = vmatprep.subr.bf16.mxu0 %v1946_v35  ;;  %v1962_v0 = vpack.c.bf16 %v651_v63, %v650_v62  ;;  %v466_v5 = vld [vmem:[#allocation2] sm:$0xff] }
  0xdc   :  { %1949 = vmatpush3.bf16.msra.mxu0 %v1946_v35  ;;  %v654_v36 = vld [vmem:[%s2463_s14] sm:$0xf]  ;;  %s2675_s14 = sld [smem:[#allocation27_spill]] }
  0xdd   :  { %1941 = vmatpush3.bf16.msra.mxu1 %v1938_v28  ;;  %1951 = vmatprep.subr.bf16.mxu0 %v1950_v58 }
  0xde   :  { %1943 = vmatprep.subr.bf16.mxu1 %v1942_v31 }
  0xe0   :  { %1953 = vmatpush3.bf16.msra.mxu0 %v1950_v58 }
  0xe1   :  { %1945 = vmatpush3.bf16.msra.mxu1 %v1942_v31  ;;  %1963 = vmatprep.subr.bf16.mxu0 %v1962_v0 }
  0xe2   :  { %1955 = vmatprep.subr.bf16.mxu1 %v1954_v37 }
 0x1ae   :  { %v1797_v7 = vpop.f32.mrb[0].mxu0 }
 0x1af   :  { %v315_v8 = vpop.f32.mrb[1].mxu0  ;;  %v321_v10 = vadd.f32 %v1797_v7, %v1684_v6 }
 0x1b0   :  { %v316_v9 = vadd.f32 %v1684_v6, %v315_v8  ;;  %v467_v6 = vld [vmem:[#allocation2 + $0x8] sm:$0xff] }
 0x1b1   :  { %v330_v12 = vsel %vm326_vm1, %v321_v10, 0.0 }
 0x1b2   :  { %v327_v11 = vsel %vm326_vm1, %v316_v9, 0.0 }
 0x1b3   :  { %328 = vadd.xlane.f32.xlu0 %v327_v11  ;;  %v653_v11 = vld [vmem:[%s2458_s12 + $0x18] sm:$0xff] }
 0x1b7   :  { %331 = vadd.xlane.f32.xlu0 %v330_v12 }
 0x240   :  { %v329_v13 = vpop.xlane.xlu0 %328 }
 0x241   :  { %v334_v14 = vmul.f32 0.020833334, %v329_v13  ;;  %v2316_v13 = vmov 0.0|0.0  }
 0x243   :  { %v336_v15 = vsub.f32 %v316_v9, %v334_v14  ;;  %v2318_v14 = vmov 0.0  }
 0x244   :  { %v332_v16 = vpop.xlane.xlu0 %331 }
 0x245   :  { %v335_v17 = vmul.f32 0.020833334, %v332_v16  ;;  %v338_v18 = vmul.f32 %v336_v15, %v336_v15  ;;  %v747_v16 = vld [vmem:[%s2671_s5] sm:$0xff] }
 0x247   :  { %v337_v19 = vsub.f32 %v321_v10, %v335_v17  ;;  %v340_v20 = vsel %vm326_vm1, %v338_v18, 0.0  ;;  %v652_v10 = vld [vmem:[%s2458_s12 + $0x10] sm:$0xff]  ;;  %v2319_v17 = vmov 0   ;;  %v474_v18 = vld [vmem:[#allocation10] sm:$0x1]  ;;  %s2679_s12 = sld [smem:[#allocation31_spill]] }
 0x248   :  { %341 = vadd.xlane.f32.xlu1 %v340_v20  ;;  %v1966_v12 = vpack.c.bf16 %v653_v11, %v652_v10  ;;  %2050 = vset.pattern.permute.xlu0 %v2319_v17 }
 0x249   :  { %v339_v21 = vmul.f32 %v337_v19, %v337_v19  ;;  %2051 = vset.pattern.permute.xlu1 %v2319_v17  ;;  %751 = vperm.xlu0 %2050, %v747_v16  }
 0x24b   :  { %v343_v22 = vsel %vm326_vm1, %v339_v21, 0.0  ;;  %v476_v21 = vlaneseq }
 0x24c   :  { %344 = vadd.xlane.f32.xlu1 %v343_v22 }
 0x24d   :  { %v477_v22 = vshrl.u32 %v476_v21, 7 }
 0x24f   :  { %v2568_v23 = vsub.s32 0, %v477_v22 }
 0x251   :  { %v479_v24 = vrot.slane %v474_v18, %v2568_v23 }
 0x2d5   :  { %v342_v38 = vpop.xlane.xlu1 %341 }
 0x2d6   :  { %v346_v39 = vmul.f32 0.020833334, %v342_v38 }
 0x2d8   :  { %v348_v40 = vadd.f32 1e-05, %v346_v39 }
 0x2d9   :  { %v345_v41 = vpop.xlane.xlu1 %344 }
 0x2da   :  { %2052 = vrsqrt.f32 %v348_v40  ;;  %v347_v42 = vmul.f32 0.020833334, %v345_v41  ;;  %v752_v41 = vpop.permute.xlu0 %751 }
 0x2dc   :  { %v349_v43 = vadd.f32 1e-05, %v347_v42 }
 0x2de   :  { %2054 = vrsqrt.f32 %v349_v43 }
 0x2e4   :  { %v2053_v44 = vpop.eup %2052 }
 0x2e5   :  { %v352_v46 = vmul.f32 %v2053_v44, %v336_v15  ;;  %v748_v15 = vld [vmem:[%s2671_s5 + $0x8] sm:$0xff] }
 0x2e6   :  { %756 = vperm.xlu1 %2051, %v748_v15  }
 0x2e7   :  { %v360_v48 = vmul.f32 %v1687_v45, %v352_v46 }
 0x2e8   :  { %v2055_v49 = vpop.eup %2054 }
 0x2e9   :  { %v353_v50 = vmul.f32 %v2055_v49, %v337_v19  ;;  %v368_v51 = vadd.f32 %v1688_v47, %v360_v48  ;;  %v649_v19 = vld [vmem:[%s2672_s3] sm:$0x1] }
 0x2ea   :  { %v761_v20 = vmul.f32 %v649_v19, %v474_v18  ;;  %v660_v25 = vrot.slane %v649_v19, %v2568_v23 }
 0x2eb   :  { %v361_v52 = vmul.f32 %v1687_v45, %v353_v50  ;;  %v370_v53 = vmax.f32 %v368_v51, 0.0 }
 0x2ed   :  { %v369_v54 = vadd.f32 %v1688_v47, %v361_v52  ;;  %1810 = vmatprep.mubr.msk.f32.mxu1 %vm326_vm1, %v370_v53 }
 0x2ef   :  { %v371_v55 = vmax.f32 %v369_v54, 0.0 }
 0x2f1   :  { %1811 = vmatmul.mubr.msk.f32.vlgmr.msra.gmra.mrb[0].mxu1 %vm326_vm1, %v371_v55 }
 0x2f2   :  { %1957 = vmatpush3.bf16.msra.mxu1 %v1954_v37 }
 0x2f3   :  { %1959 = vmatprep.subr.bf16.mxu1 %v1958_v61 }
 0x2f6   :  { %1961 = vmatpush3.bf16.msra.mxu1 %v1958_v61 }
 0x2f7   :  { %1970 = vmatprep.subr.bf16.mxu1 %v2316_v13 }
 0x365   :  { %v757_v38 = vpop.permute.xlu1 %756 }
 0x3c4   :  { %v1812_v2 = vpop.f32.mrb[0].mxu1 }
 0x3c5   :  { %v463_v3 = vadd.f32 %v1812_v2, %v1689_v1  ;;  %v457_v4 = vpop.f32.mrb[1].mxu1 }
 0x3c6   :  { %v458_v7 = vadd.f32 %v1689_v1, %v457_v4 }
 0x3c7   :  { %v469_v9 = vadd.f32 %v467_v6, %v463_v3  ;;  %v655_v3 = vld [vmem:[%s2468_s9] sm:$0xff]  ;;  %v567_v6 = vld [vmem:[#allocation12] sm:$0x1]  ;;  %s2673_s9 = sld [smem:[#allocation23_spill]] }
 0x3c8   :  { %v468_v8 = vadd.f32 %v466_v5, %v458_v7  ;;  %v572_v7 = vrot.slane %v567_v6, %v2568_v23 }
 0x3ca   :  { %1821 = vmatprep.mubr.msk.f32.mxu0 %vm481_vm2, %v468_v8  ;;  %1832 = vmatprep.mubr.msk.f32.mxu1 %vm481_vm2, %v468_v8 }
 0x3cb   :  { %1822 = vmatmul.mubr.msk.f32.vlgmr.msra.gmra.mrb[2].mxu0 %vm481_vm2, %v469_v9  ;;  %1833 = vmatmul.mubr.msk.f32.vlgmr.msra.gmra.mrb[2].mxu1 %vm481_vm2, %v469_v9 }
 0x3cc   :  { %1965 = vmatpush3.bf16.msra.mxu0 %v1962_v0  ;;  %1854 = vmatprep.mubr.msk.f32.mxu1 %vm2317_vm3, %v2318_v14 }
 0x3cd   :  { %1967 = vmatprep.subr.bf16.mxu0 %v1966_v12  ;;  %1972 = vmatpush3.bf16.msra.mxu1 %v1962_v0  ;;  %v1248_v21 = vld [vmem:[%s2673_s9] sm:$0xff]  ;;  %v1249_v22 = vld [vmem:[%s2673_s9 + $0x8] sm:$0xff] }
 0x3ce   :  { %1973 = vmatprep.subr.bf16.mxu1 %v2316_v13 }
 0x3d0   :  { %1969 = vmatpush3.bf16.msra.mxu0 %v1966_v12 }
 0x3d1   :  { %1976 = vmatprep.subr.bf16.mxu0 %v2316_v13  ;;  %1975 = vmatpush3.bf16.msra.mxu1 %v1966_v12 }
 0x3d2   :  { %1869 = vmatprep.subr.mxu1 %v2318_v14 }
 0x3d4   :  { %1855 = vmatmul.mubr.msk.f32.vlgmr.msra.gmra.mrb[4].mxu1 %vm481_vm2, %v761_v20 }
 0x3d5   :  { %1871 = vmatprep.mubr.msk.f32.mxu1 %vm2317_vm3, %v2318_v14  ;;  %1870 = vmatpush3.msk.msra.mxu1 %vm944_vm4, %v654_v36 }
 0x3d6   :  { %1881 = vmatprep.subr.mxu1 %v2318_v14 }
 0x49e   :  { %v1823_v26 = vpop.f32.mrb[2].mxu0  ;;  %v2572_v27 = vpop.f32.mrb[2].mxu1 }
 0x49f   :  { %v560_v28 = vadd.f32 %v1823_v26, %v479_v24  ;;  %v554_v29 = vpop.f32.mrb[3].mxu0  ;;  %v2574_v30 = vpop.f32.mrb[3].mxu1  ;;  %v646_v12 = vadd.f32 %v2572_v27, %v572_v7  ;;  %v1251_v26 = vld [vmem:[%s2673_s9 + $0x18] sm:$0xff] }
 0x4a0   :  { %v555_v31 = vadd.f32 %v554_v29, %v479_v24  ;;  %v641_v15 = vadd.f32 %v2574_v30, %v572_v7  ;;  %v1983_v24 = vpack.c.bf16 %v1249_v22, %v1248_v21  ;;  %v1562_v21 = vld [vmem:[%s2679_s12 + $0x8] sm:$0xff] }
 0x4a1   :  { %v663_v32 = vmul.f32 %v660_v25, %v560_v28 }
 0x4a2   :  { %v662_v33 = vmul.f32 %v660_v25, %v555_v31  ;;  %v1250_v25 = vld [vmem:[%s2673_s9 + $0x10] sm:$0xff] }
 0x4a3   :  { %v1986_v27 = vpack.c.bf16 %v1251_v26, %v1250_v25  ;;  %v1564_v25 = vld [vmem:[%s2679_s12 + $0x18] sm:$0xff] }
 0x4a4   :  { %1843 = vmatprep.mubr.msk.f32.mxu0 %vm481_vm2, %v662_v33 }
 0x4a5   :  { %1844 = vmatmul.mubr.msk.f32.vlgmr.msra.gmra.mrb[4].mxu0 %vm481_vm2, %v663_v32 }
 0x4a6   :  { %1861 = vmatprep.mubr.msk.f32.mxu0 %vm2317_vm3, %v2318_v14 }
 0x4a7   :  { %v831_v34 = vpop.f32.mrb[4].mxu1 }
 0x4a8   :  { %v1856_v35 = vpop.f32.mrb[5].mxu1  ;;  %v835_v52 = vmul.f32 0.35355338, %v831_v34 }
 0x578   :  { %v1845_v37 = vpop.f32.mrb[4].mxu0 }
 0x579   :  { %v746_v39 = vmul.f32 0.35355338, %v1845_v37  ;;  %v736_v40 = vpop.f32.mrb[5].mxu0  ;;  %v1708_v37 = vld [vmem:[#allocation13] ss:$0 sm:$0xff] }
 0x57a   :  { %v745_v42 = vmul.f32 0.35355338, %v736_v40 }
 0x57b   :  { %v760_v43 = vadd.f32 %v757_v38, %v746_v39 }
 0x57c   :  { %v759_v44 = vadd.f32 %v752_v41, %v745_v42 }
 0x57d   :  { %v838_v45 = vsel %vm836_vm5, %v760_v43, -inf }
 0x57e   :  { %v837_v46 = vsel %vm836_vm5, %v759_v44, -inf }
 0x57f   :  { %v839_v47 = vmax.f32 %v837_v46, %v838_v45  ;;  %v1362_v46 = vld [vmem:[%s2674_s8] sm:$0xff] }
 0x581   :  { %v840_v48 = vrot.slane %v839_v47, 4 }
 0x583   :  { %v841_v49 = vmax.f32 %v839_v47, %v840_v48  ;;  %v1363_v47 = vld [vmem:[%s2674_s8 + $0x8] sm:$0xff] }
 0x584   :  { %v1989_v48 = vpack.c.bf16 %v1363_v47, %v1362_v46 }
 0x585   :  { %v842_v50 = vrot.slane %v841_v49, 2 }
 0x587   :  { %v843_v51 = vmax.f32 %v841_v49, %v842_v50  ;;  %v1364_v49 = vld [vmem:[%s2674_s8 + $0x10] sm:$0xff]  ;;  %v1365_v50 = vld [vmem:[%s2674_s8 + $0x18] sm:$0xff] }
 0x589   :  { %v844_v53 = vrot.slane %v843_v51, 1 }
 0x58b   :  { %v845_v54 = vmax.f32 %v843_v51, %v844_v53  ;;  %v1992_v51 = vpack.c.bf16 %v1365_v50, %v1364_v49  ;;  %v1448_v53 = vld [vmem:[%s2675_s14 + $0x8] sm:$0xff] }
 0x58d   :  { %v846_v55 = vmax.f32 %v845_v54, %v835_v52 }
 0x58f   :  { %v850_v56 = vrot.slane %v846_v55, %v2568_v23  ;;  %v857_v57 = vsub.f32 %v835_v52, %v846_v55  ;;  %v1447_v52 = vld [vmem:[%s2675_s14] sm:$0xff] }
 0x590   :  { %v1995_v54 = vpack.c.bf16 %v1448_v53, %v1447_v52 }
 0x591   :  { %v851_v58 = vsub.f32 %v759_v44, %v850_v56  ;;  %v852_v59 = vsub.f32 %v760_v43, %v850_v56  ;;  %v858_v60 = vmul.f32 1.442695, %v857_v57 }
 0x593   :  { %v853_v61 = vmul.f32 1.442695, %v851_v58  ;;  %v855_v62 = vmul.f32 1.442695, %v852_v59  ;;  %2056 = vpow2.f32 %v858_v60  ;;  %v1710_v59 = vld [vmem:[#allocation15] ss:$0 sm:$0xff] }
 0x595   :  { %2058 = vpow2.f32 %v853_v61  ;;  %v1711_v61 = vld [vmem:[%s2676_s19] ss:$0 sm:$0xff] }
 0x596   :  { %2060 = vpow2.f32 %v855_v62 }
 0x59d   :  { %v2057_v63 = vpop.eup %2056 }
 0x59e   :  { %1872 = vmatmul.mubr.msk.f32.vlgmr.msra.gmra.mrb[6].mxu1 %vm836_vm5, %v2057_v63  ;;  %v863_v8 = vrot.slane %v2057_v63, %v2568_v23 }
 0x59f   :  { %v2059_v0 = vpop.eup %2058  ;;  %1882 = vmatpush3.msk.msra.mxu1 %vm944_vm4, %v654_v36  ;;  %1883 = vmatprep.mubr.msk.f32.mxu1 %vm2317_vm3, %v2318_v14 }
 0x5a0   :  { %v2061_v1 = vpop.eup %2060  ;;  %1988 = vmatprep.subr.bf16.mxu1 %v2316_v13 }
 0x5a1   :  { %v1977_v2 = vpack.c.bf16 %v2061_v1, %v2059_v0 }
 0x5a3   :  { %1978 = vmatpush3.bf16.msra.mxu0 %v1977_v2 }
 0x5a4   :  { %1864 = vmatprep.subr.msk.mxu0 %vm944_vm4, %v654_v36 }
 0x5a6   :  { %1862 = vmatmul.mubr.msk.f32.vlgmr.msra.gmra.mrb[6].mxu0 %vm864_vm6, %v655_v3 }
 0x5a7   :  { %1865 = vmatpush3.msk.msra.mxu0 %vm944_vm4, %v654_v36  ;;  %1866 = vmatprep.mubr.msk.f32.mxu0 %vm836_vm5, %v2059_v0  ;;  %v1449_v0 = vld [vmem:[%s2675_s14 + $0x10] sm:$0xff] }
 0x5a8   :  { %1979 = vmatprep.subr.bf16.mxu0 %v2316_v13 }
 0x5aa   :  { %1867 = vmatmul.mubr.msk.f32.vlgmr.msra.gmra.mrb[8].mxu0 %vm836_vm5, %v2061_v1  ;;  %v1450_v1 = vld [vmem:[%s2675_s14 + $0x18] sm:$0xff] }
 0x5ab   :  { %1878 = vmatprep.mubr.msk.f32.mxu0 %vm2317_vm3, %v2318_v14  ;;  %v1998_v2 = vpack.c.bf16 %v1450_v1, %v1449_v0 }
 0x671   :  { %v1094_v4 = vpop.f32.mrb[6].mxu1 }
 0x672   :  { %v1873_v5 = vpop.f32.mrb[7].mxu1  ;;  %v1098_v30 = vmul.f32 %v1094_v4, %v567_v6 }
 0x674   :  { %v1102_v31 = vrot.slane %v1098_v30, %v2568_v23 }
 0x679   :  { %v934_v9 = vpop.f32.mrb[6].mxu0 }
 0x67a   :  { %v935_v10 = vadd.f32 %v934_v9, %v863_v8  ;;  %v1863_v11 = vpop.f32.mrb[7].mxu0  ;;  %v1714_v8 = vld [vmem:[%s2678_s6] ss:$0 sm:$0xff] }
 0x67c   :  { %1884 = vmatmul.mubr.msk.f32.vlgmr.msra.gmra.mrb[8].mxu1 %vm836_vm5, %v935_v10 }
 0x67d   :  { %v1868_v16 = vpop.f32.mrb[8].mxu0  ;;  %1905 = vmatprep.mubr.msk.f32.mxu1 %vm2317_vm3, %v2318_v14  ;;  %1990 = vmatpush3.bf16.msra.mxu1 %v1989_v48 }
 0x67e   :  { %v1024_v17 = vmul.f32 %v1868_v16, %v646_v12  ;;  %v1014_v18 = vpop.f32.mrb[9].mxu0  ;;  %1991 = vmatprep.subr.bf16.mxu1 %v2316_v13 }
 0x67f   :  { %v1023_v19 = vmul.f32 %v1014_v18, %v641_v15 }
 0x681   :  { %v1980_v20 = vpack.c.bf16 %v1024_v17, %v1023_v19  ;;  %1993 = vmatpush3.bf16.msra.mxu1 %v1992_v51 }
 0x682   :  { %2000 = vmatprep.subr.bf16.mxu1 %v2316_v13 }
 0x683   :  { %1981 = vmatpush3.bf16.msra.mxu0 %v1980_v20  ;;  %v1561_v20 = vld [vmem:[%s2679_s12] sm:$0xff] }
 0x684   :  { %1982 = vmatprep.subr.bf16.mxu0 %v2316_v13  ;;  %v2001_v22 = vpack.c.bf16 %v1562_v21, %v1561_v20 }
 0x686   :  { %1879 = vmatmul.mubr.msk.f32.vlgmr.msra.gmra.mrb[10].mxu0 %vm864_vm6, %v655_v3  ;;  %v1712_v3 = vld [vmem:[%s2677_s30] ss:$0 sm:$0xff] }
 0x687   :  { %1894 = vmatprep.mubr.msk.f32.mxu0 %vm2317_vm3, %v2318_v14  ;;  %1984 = vmatpush3.bf16.msra.mxu0 %v1983_v24  ;;  %v1563_v24 = vld [vmem:[%s2679_s12 + $0x10] sm:$0xff] }
 0x688   :  { %1985 = vmatprep.subr.bf16.mxu0 %v2316_v13  ;;  %v2004_v26 = vpack.c.bf16 %v1564_v25, %v1563_v24 }
 0x68b   :  { %1987 = vmatpush3.bf16.msra.mxu0 %v1986_v27 }
 0x68c   :  { %1994 = vmatprep.subr.bf16.mxu0 %v2316_v13 }
 0x74f   :  { %v1242_v28 = vpop.f32.mrb[8].mxu1 }
 0x750   :  { %2062 = vrcp.f32 %v1242_v28  ;;  %v1885_v29 = vpop.f32.mrb[9].mxu1 }
 0x759   :  { %v1169_v32 = vpop.f32.mrb[10].mxu0 }
 0x75a   :  { %v2063_v33 = vpop.eup %2062  ;;  %v1170_v34 = vadd.f32 %v1169_v32, %v1102_v31  ;;  %v1880_v35 = vpop.f32.mrb[11].mxu0  ;;  %v1716_v31 = vld [vmem:[%s2680_s27] ss:$0 sm:$0xff] }
 0x75c   :  { %v1247_v36 = vmul.f32 %v2063_v33, %v1170_v34  ;;  %v1717_v33 = vld [vmem:[%s2681_s17] ss:$0 sm:$0xff] }
 0x75e   :  { %1895 = vmatmul.mubr.msk.f32.vlgmr.msra.gmra.mrb[12].mxu0 %vm481_vm2, %v1247_v36  ;;  %v1718_v36 = vld [vmem:[%s2682_s1] ss:$0 sm:$0xff] }
 0x75f   :  { %1916 = vmatprep.mubr.msk.f32.mxu0 %vm2317_vm3, %v2318_v14  ;;  %1996 = vmatpush3.bf16.msra.mxu0 %v1995_v54 }
 0x760   :  { %1997 = vmatprep.subr.bf16.mxu0 %v2316_v13 }
 0x763   :  { %1999 = vmatpush3.bf16.msra.mxu0 %v1998_v2 }
 0x831   :  { %v1328_v38 = vpop.f32.mrb[12].mxu0 }
 0x832   :  { %v1329_v39 = vadd.f32 %v1708_v37, %v1328_v38  ;;  %v1896_v40 = vpop.f32.mrb[13].mxu0 }
 0x834   :  { %v1334_v23 = vsel %vm481_vm2, %v1329_v39, 0.0 }
 0x835   :  { %1335 = vadd.xlane.f32.xlu1 %v1334_v23 }
 0x8c2   :  { %v1336_v41 = vpop.xlane.xlu1 %1335 }
 0x8c3   :  { %v1338_v42 = vmul.f32 0.03125, %v1336_v41 }
 0x8c5   :  { %v1339_v43 = vsub.f32 %v1329_v39, %v1338_v42 }
 0x8c7   :  { %v1340_v44 = vmul.f32 %v1339_v43, %v1339_v43 }
 0x8c9   :  { %v1341_v45 = vsel %vm481_vm2, %v1340_v44, 0.0 }
 0x8ca   :  { %1342 = vadd.xlane.f32.xlu0 %v1341_v45 }
 0x957   :  { %v1343_v55 = vpop.xlane.xlu0 %1342 }
 0x958   :  { %v1344_v56 = vmul.f32 0.03125, %v1343_v55 }
 0x95a   :  { %v1345_v57 = vadd.f32 1e-05, %v1344_v56 }
 0x95c   :  { %2064 = vrsqrt.f32 %v1345_v57 }
 0x966   :  { %v2065_v58 = vpop.eup %2064 }
 0x967   :  { %v1347_v60 = vmul.f32 %v2065_v58, %v1339_v43 }
 0x969   :  { %v1354_v62 = vmul.f32 %v1710_v59, %v1347_v60 }
 0x96b   :  { %v1361_v63 = vadd.f32 %v1711_v61, %v1354_v62 }
 0x96d   :  { %1906 = vmatmul.mubr.msk.f32.vlgmr.msra.gmra.mrb[10].mxu1 %vm481_vm2, %v1361_v63 }
 0x96e   :  { %1927 = vmatprep.mubr.msk.f32.mxu1 %vm2317_vm3, %v2318_v14  ;;  %2002 = vmatpush3.bf16.msra.mxu1 %v2001_v22 }
 0x96f   :  { %2003 = vmatprep.subr.bf16.mxu1 %v2316_v13 }
 0x972   :  { %2005 = vmatpush3.bf16.msra.mxu1 %v2004_v26 }
 0xa40   :  { %v1442_v4 = vpop.f32.mrb[10].mxu1 }
 0xa41   :  { %v1443_v5 = vadd.f32 %v1712_v3, %v1442_v4  ;;  %v1907_v6 = vpop.f32.mrb[11].mxu1 }
 0xa43   :  { %v1446_v7 = vmax.f32 %v1443_v5, 0.0 }
 0xa45   :  { %1917 = vmatmul.mubr.msk.f32.vlgmr.msra.gmra.mrb[14].mxu0 %vm481_vm2, %v1446_v7 }
 0xb18   :  { %v1527_v9 = vpop.f32.mrb[14].mxu0 }
 0xb19   :  { %v1528_v10 = vadd.f32 %v1714_v8, %v1527_v9  ;;  %v1918_v11 = vpop.f32.mrb[15].mxu0 }
 0xb1b   :  { %v1531_v14 = vadd.f32 %v1528_v10, %v1361_v63 }
 0xb1d   :  { %v1534_v12 = vsel %vm481_vm2, %v1531_v14, 0.0 }
 0xb1e   :  { %1535 = vadd.xlane.f32.xlu1 %v1534_v12 }
 0xbab   :  { %v1536_v15 = vpop.xlane.xlu1 %1535 }
 0xbac   :  { %v1537_v16 = vmul.f32 0.03125, %v1536_v15 }
 0xbae   :  { %v1538_v17 = vsub.f32 %v1531_v14, %v1537_v16 }
 0xbb0   :  { %v1539_v18 = vmul.f32 %v1538_v17, %v1538_v17 }
 0xbb2   :  { %v1540_v19 = vsel %vm481_vm2, %v1539_v18, 0.0 }
 0xbb3   :  { %1541 = vadd.xlane.f32.xlu1 %v1540_v19 }
 0xc40   :  { %v1542_v27 = vpop.xlane.xlu1 %1541 }
 0xc41   :  { %v1543_v28 = vmul.f32 0.03125, %v1542_v27 }
 0xc43   :  { %v1544_v29 = vadd.f32 1e-05, %v1543_v28 }
 0xc45   :  { %2066 = vrsqrt.f32 %v1544_v29 }
 0xc4f   :  { %v2067_v30 = vpop.eup %2066 }
 0xc50   :  { %v1546_v32 = vmul.f32 %v2067_v30, %v1538_v17 }
 0xc52   :  { %v1553_v34 = vmul.f32 %v1716_v31, %v1546_v32 }
 0xc54   :  { %v1560_v35 = vadd.f32 %v1717_v33, %v1553_v34 }
 0xc56   :  { %1928 = vmatmul.mubr.msk.f32.vlgmr.msra.gmra.mrb[12].mxu1 %vm481_vm2, %v1560_v35 }
 0xd29   :  { %v1641_v13 = vpop.f32.mrb[12].mxu1 }
 0xd2a   :  { %v1642_v37 = vadd.f32 %v1718_v36, %v1641_v13  ;;  %v1929_v38 = vpop.f32.mrb[13].mxu1 }
 0xd2c   :  { %1645 = vst [vmem:[%s2473_s4] sm:$0xff] %v1642_v37 }
 0xd2d   :  { %1650 = vsyncpa [#allocation3], 1 }
 0xd2e   :  { %1651 = vsyncpa [#allocation5], 1 }
 0xd2f   :  { %1652 = vsyncpa [#allocation8], 1 }
 0xd30   :  { %1653 = vsyncpa [#allocation11], 1 }
 0xd31   :  { %1654 = vsyncpa [#allocation14], 1 }

</bundles_post_ra>
